<compile_context>
chip_gen: v7x
topology: tpu7x:2x2x1
jax: 0.10.0
libtpu: 0.0.40
codegen_flags: <defaults>
</compile_context>

<pallas_src>
import jax
import jax.numpy as jnp
from jax.experimental import pallas as pl
from jax.experimental.pallas import tpu as pltpu

_LANE = 128
_SUBLANE = 8
_CHUNK = _LANE * _SUBLANE  # 1024: minimum lane- and sublane-dense feature tile


def _make_bce_mean_kernel(true_features: int):
    """Kernel body; `true_features` = C*H*W of the ORIGINAL (unpadded) input."""
    inv_d = 1.0 / float(true_features)

    def kernel(pred_ref, gt_ref, out_ref, acc_ref):
        k = pl.program_id(1)

        @pl.when(k == 0)
        def _init():
            acc_ref[...] = jnp.zeros_like(acc_ref)

        x = pred_ref[...].astype(jnp.float32)
        y = gt_ref[...].astype(jnp.float32)

        # Numerically-stable BCE-with-logits (matches PyTorch):
        #   max(x, 0) - x*y + log(1 + exp(-|x|))
        loss = jnp.maximum(x, 0.0) - x * y + jnp.log1p(jnp.exp(-jnp.abs(x)))

        # Lane-dense accumulation: reduce only the sublane (rows) axis per step.
        # loss: (tile_n, rows_per_tile, 128) -> (tile_n, 128)
        acc_ref[...] += jnp.sum(loss, axis=1)

        @pl.when(k == pl.num_programs(1) - 1)
        def _finalize():
            # Single 128 -> 1 cross-lane reduce, once per batch block.
            out_ref[...] = jnp.sum(acc_ref[...], axis=-1, keepdims=True) * inv_d

    return kernel


def fc_discriminator_criterion(pred, gt, *, max_feat_tile=4096,
                               input_vmem_budget_bytes=16 * 1024 * 1024):
    """pred, gt: (N, C, H, W) (any trailing dims). Returns per-sample mean
    BCE-with-logits over all non-batch dims, shape (N,), float32."""
    assert pred.shape == gt.shape, "pred and gt must have the same shape"
    n = int(pred.shape[0])
    d = 1
    for s in pred.shape[1:]:
        d *= int(s)

    itemsize = jnp.dtype(pred.dtype).itemsize

    # Batch tiling: parallel grid axis (useful on v7x megacore), harmless elsewhere.
    tile_n = min(n, 8)
    n_pad = pl.cdiv(n, tile_n) * tile_n

    # Feature tile: multiple of 1024 lanes, derived from a conservative VMEM
    # budget for 2 inputs x 2 pipeline buffers (safe on v7x's 64 MiB VMEM).
    per_buffer_budget = input_vmem_budget_bytes // 4
    budget_tile = per_buffer_budget // max(1, tile_n * itemsize)
    feat_tile = min(max_feat_tile, budget_tile)
    feat_tile = max(_CHUNK, (feat_tile // _CHUNK) * _CHUNK)
    d_needed = pl.cdiv(d, _CHUNK) * _CHUNK
    feat_tile = min(feat_tile, d_needed)

    # Pad feature axis to a multiple of feat_tile with (pred=+80, gt=1): each
    # padded element contributes ~0 loss; always divide by the TRUE d.
    d_pad = pl.cdiv(d, feat_tile) * feat_tile

    pred2 = pred.reshape(n, d)
    gt2 = gt.reshape(n, d)
    if d_pad != d:
        pred2 = jnp.pad(pred2, ((0, 0), (0, d_pad - d)), constant_values=80.0)
        gt2 = jnp.pad(gt2, ((0, 0), (0, d_pad - d)), constant_values=1.0)
    if n_pad != n:
        # Padded batch rows are discarded after the kernel.
        pred2 = jnp.pad(pred2, ((0, n_pad - n), (0, 0)))
        gt2 = jnp.pad(gt2, ((0, n_pad - n), (0, 0)))

    rows = d_pad // _LANE
    rows_per_tile = feat_tile // _LANE          # multiple of 8 by construction
    num_feat_tiles = rows // rows_per_tile
    num_batch_tiles = n_pad // tile_n

    # (N, rows, 128): lane- and sublane-dense tiles even for tiny N.
    pred3 = pred2.reshape(n_pad, rows, _LANE)
    gt3 = gt2.reshape(n_pad, rows, _LANE)

    kernel = _make_bce_mean_kernel(d)

    out = pl.pallas_call(
        kernel,
        out_shape=jax.ShapeDtypeStruct((n_pad, 1), jnp.float32),
        grid_spec=pltpu.PrefetchScalarGridSpec(
            num_scalar_prefetch=0,
            grid=(num_batch_tiles, num_feat_tiles),
            in_specs=[
                pl.BlockSpec((tile_n, rows_per_tile, _LANE),
                             lambda i, k: (i, k, 0)),
                pl.BlockSpec((tile_n, rows_per_tile, _LANE),
                             lambda i, k: (i, k, 0)),
            ],
            out_specs=pl.BlockSpec((tile_n, 1), lambda i, k: (i, 0)),
            scratch_shapes=[pltpu.VMEM((tile_n, _LANE), jnp.float32)],
        ),
        compiler_params=pltpu.CompilerParams(
            dimension_semantics=("parallel", "arbitrary"),
            vmem_limit_bytes=32 * 1024 * 1024,
        ),
    )(pred3, gt3)

    return out[:n, 0]


def _reference(pred, gt):
    x = pred.astype(jnp.float32)
    y = gt.astype(jnp.float32)
    loss = jnp.maximum(x, 0.0) - x * y + jnp.log1p(jnp.exp(-jnp.abs(x)))
    return jnp.mean(loss, axis=tuple(range(1, pred.ndim)))


if __name__ == "__main__":
    key = jax.random.PRNGKey(0)
    k_pred, k_gt = jax.random.split(key)

    N, C, H, W = 2, 4, 16, 16
    pred = jax.random.normal(k_pred, (N, C, H, W), dtype=jnp.float32) * 3.0
    # Discriminator ground truth: 0/1 labels broadcast over the map.
    gt = (jax.random.uniform(k_gt, (N, C, H, W)) > 0.5).astype(jnp.float32)

    out = fc_discriminator_criterion(pred, gt)
    out = jax.block_until_ready(out)

    ref = _reference(pred, gt)
    assert out.shape == (N,), f"bad output shape {out.shape}"
    assert jnp.allclose(out, ref, atol=1e-5, rtol=1e-5), (out, ref)

    print("KERNEL_OK")
</pallas_src>

<mosaic_0001>
module attributes {stable_mosaic.version = 11 : i64} {
  func.func @kernel(%arg0: i32, %arg1: i32, %arg2: memref<2x8x128xf32, #tpu.memory_space<vmem>>, %arg3: memref<2x8x128xf32, #tpu.memory_space<vmem>>, %arg4: memref<2x1xf32, #tpu.memory_space<vmem>>, %arg5: memref<2x128xf32, #tpu.memory_space<vmem>>) attributes {dimension_semantics = [#tpu.dimension_semantics<parallel>, #tpu.dimension_semantics<arbitrary>], iteration_bounds = array<i64: 1, 1>, scalar_prefetch = 0 : i64, scratch_operands = 1 : i64, tpu.core_type = #tpu.core_type<tc>, window_params = [{transform_indices = @transform_0, window_bounds = array<i64: 2, 8, 128>}, {transform_indices = @transform_1, window_bounds = array<i64: 2, 8, 128>}, {transform_indices = @transform_2, window_bounds = array<i64: 2, 1>}]} {
    %c0_i32 = arith.constant 0 : i32
    %0 = arith.cmpi eq, %arg1, %c0_i32 : i32
    %1 = arith.extui %0 : i1 to i32
    %c0_i32_0 = arith.constant 0 : i32
    %2 = arith.cmpi ne, %1, %c0_i32_0 : i32
    scf.if %2 {
      %cst_14 = arith.constant 0.000000e+00 : f32
      %22 = vector.broadcast %cst_14 : f32 to vector<2x128xf32>
      %c0_15 = arith.constant 0 : index
      %c0_16 = arith.constant 0 : index
      %23 = vector.load %arg5[%c0_15, %c0_16] : memref<2x128xf32, #tpu.memory_space<vmem>>, vector<2x128xf32>
      tpu.vector_store %arg5[%c0_15, %c0_16], %22 {strides = array<i32>} : memref<2x128xf32, #tpu.memory_space<vmem>>, vector<2x128xf32>,
    } else {
    }
    %c0 = arith.constant 0 : index
    %c0_1 = arith.constant 0 : index
    %c0_2 = arith.constant 0 : index
    %3 = vector.load %arg2[%c0, %c0_1, %c0_2] : memref<2x8x128xf32, #tpu.memory_space<vmem>>, vector<2x8x128xf32>
    %c0_3 = arith.constant 0 : index
    %c0_4 = arith.constant 0 : index
    %c0_5 = arith.constant 0 : index
    %4 = vector.load %arg3[%c0_3, %c0_4, %c0_5] : memref<2x8x128xf32, #tpu.memory_space<vmem>>, vector<2x8x128xf32>
    %cst = arith.constant 0.000000e+00 : f32
    %5 = vector.broadcast %cst : f32 to vector<2x8x128xf32>
    %6 = arith.maximumf %3, %5 : vector<2x8x128xf32>
    %7 = arith.mulf %3, %4 : vector<2x8x128xf32>
    %8 = arith.subf %6, %7 : vector<2x8x128xf32>
    %9 = math.absf %3 : vector<2x8x128xf32>
    %cst_6 = arith.constant 0.000000e+00 : f32
    %10 = vector.broadcast %cst_6 : f32 to vector<2x8x128xf32>
    %11 = arith.subf %10, %9 : vector<2x8x128xf32>
    %12 = math.exp %11 : vector<2x8x128xf32>
    %13 = math.log1p %12 : vector<2x8x128xf32>
    %14 = arith.addf %8, %13 : vector<2x8x128xf32>
    %c0_7 = arith.constant 0 : index
    %c0_8 = arith.constant 0 : index
    %15 = vector.load %arg5[%c0_7, %c0_8] : memref<2x128xf32, #tpu.memory_space<vmem>>, vector<2x128xf32>
    %cst_9 = arith.constant dense<0.000000e+00> : vector<2x128xf32>
    %16 = vector.multi_reduction <add>, %14, %cst_9 [1] : vector<2x8x128xf32> to vector<2x128xf32>
    %17 = arith.addf %15, %16 : vector<2x128xf32>
    %c0_10 = arith.constant 0 : index
    %c0_11 = arith.constant 0 : index
    %18 = vector.load %arg5[%c0_10, %c0_11] : memref<2x128xf32, #tpu.memory_space<vmem>>, vector<2x128xf32>
    tpu.vector_store %arg5[%c0_10, %c0_11], %17 {strides = array<i32>} : memref<2x128xf32, #tpu.memory_space<vmem>>, vector<2x128xf32>,
    %c0_i32_12 = arith.constant 0 : i32
    %19 = arith.cmpi eq, %arg1, %c0_i32_12 : i32
    %20 = arith.extui %19 : i1 to i32
    %c0_i32_13 = arith.constant 0 : i32
    %21 = arith.cmpi ne, %20, %c0_i32_13 : i32
    scf.if %21 {
      %c0_14 = arith.constant 0 : index
      %c0_15 = arith.constant 0 : index
      %22 = vector.load %arg5[%c0_14, %c0_15] : memref<2x128xf32, #tpu.memory_space<vmem>>, vector<2x128xf32>
      %cst_16 = arith.constant dense<0.000000e+00> : vector<2xf32>
      %23 = vector.multi_reduction <add>, %22, %cst_16 [1] : vector<2x128xf32> to vector<2xf32>
      %24 = vector.shape_cast %23 : vector<2xf32> to vector<2x1xf32>
      %cst_17 = arith.constant 9.765625E-4 : f32
      %25 = vector.broadcast %cst_17 : f32 to vector<2x1xf32>
      %26 = arith.mulf %24, %25 : vector<2x1xf32>
      %c0_18 = arith.constant 0 : index
      %c0_19 = arith.constant 0 : index
      %27 = vector.load %arg4[%c0_18, %c0_19] : memref<2x1xf32, #tpu.memory_space<vmem>>, vector<2x1xf32>
      tpu.vector_store %arg4[%c0_18, %c0_19], %26 {strides = array<i32>} : memref<2x1xf32, #tpu.memory_space<vmem>>, vector<2x1xf32>,
    } else {
    }
    return
  }
  func.func @transform_0(%arg0: i32, %arg1: i32) -> (i32, i32, i32) {
    %c0_i32 = arith.constant 0 : i32
    %c0_i32_0 = arith.constant 0 : i32
    return %arg0, %arg1, %c0_i32 : i32, i32, i32
  }
  func.func @transform_1(%arg0: i32, %arg1: i32) -> (i32, i32, i32) {
    %c0_i32 = arith.constant 0 : i32
    %c0_i32_0 = arith.constant 0 : i32
    return %arg0, %arg1, %c0_i32 : i32, i32, i32
  }
  func.func @transform_2(%arg0: i32, %arg1: i32) -> (i32, i32) {
    %c0_i32 = arith.constant 0 : i32
    %c0_i32_0 = arith.constant 0 : i32
    return %arg0, %c0_i32 : i32, i32
  }
}

</mosaic_0001>

<bundles_post_ra>
// kernel: tpu_custom_call.1
= control target key start
LH: loop header
LB: loop body
LE: loop exit
PB: predicated region body
PF: predicated region fallthrough
CT: control target
= control target key end

     0   :  { %7 = vsyncpa [#allocation4], 0  ;;  %s227_s0 = inlined_call_operand.hbm [shape: f32[2,8,128], index: 0, kind: input, shape index: {}]   ;;  %s228_s1 = inlined_call_operand.hbm [shape: f32[2,8,128], index: 1, kind: input, shape index: {}]   ;;  %s229_s2 = inlined_call_operand.vmem [shape: f32[2,1], index: 2, kind: output, shape index: {}]  }
   0x1   :  { %8 = vsyncpa [#allocation6], 0  ;;  %s180_s9 = smov [#allocation3]   ;;  %s132_s13 = scalar_lea.hbm %s227_s0, 256 }
   0x2   :  { %s14_s10 = sshll.u32 %s180_s9, 4  ;;  %p133_p0 = scmp.ne.s32.totalorder %s227_s0, %s132_s13  ;;  %s15_s10 = int_to_ptr.vmem [resolvable:$true] %s14_s10 }
   0x3   :  { %p136_p1 = scmp.lt.u32.totalorder %s132_s13, %s227_s0 }
   0x5   :  { %p138_p2 = pnand %p136_p1, %p133_p0 }
   0x7   :  { %141 = shalt.err (!%p138_p2)
}
   0x8   :  { %s142_s18 = scalar_lea.vmem %s15_s10, 256  ;;  %p147_p4 = scmp.lt.s32.totalorder %s15_s10, %s15_s10 }
   0x9   :  { %p143_p3 = scmp.ne.s32.totalorder %s15_s10, %s142_s18  ;;  %p148_p5 = scmp.lt.s32.totalorder %s142_s18, %s142_s18 }
   0xb   :  { %p149_p6 = por %p148_p5, %p147_p4 }
   0xd   :  { %p150_p7 = pnand %p149_p6, %p143_p3 }
   0xf   :  { %153 = shalt.err (!%p150_p7)
}
  0x10   :  { %s181_s19 = smov 128   ;;  %s182_s20 = smov 8  }
  0x11   :  { %20 = dma.hbm_to_vmem [thread:$0]  %s227_s0, 256, %s15_s10, [#allocation4], %s181_s19, %s181_s19, %s182_s20  }
  0x12   :  { %s183_s23 = smov [#allocation5]   ;;  %s154_s27 = scalar_lea.hbm %s228_s1, 256 }
  0x13   :  { %s26_s24 = sshll.u32 %s183_s23, 4  ;;  %p155_p8 = scmp.ne.s32.totalorder %s228_s1, %s154_s27  ;;  %s27_s24 = int_to_ptr.vmem [resolvable:$true] %s26_s24 }
  0x14   :  { %p158_p9 = scmp.lt.u32.totalorder %s154_s27, %s228_s1 }
  0x16   :  { %p160_p10 = pnand %p158_p9, %p155_p8 }
  0x18   :  { %163 = shalt.err (!%p160_p10)
}
  0x19   :  { %s164_s4 = scalar_lea.vmem %s27_s24, 256  ;;  %p169_p12 = scmp.lt.s32.totalorder %s27_s24, %s27_s24 }
  0x1a   :  { %p165_p11 = scmp.ne.s32.totalorder %s27_s24, %s164_s4  ;;  %p170_p13 = scmp.lt.s32.totalorder %s164_s4, %s164_s4 }
  0x1c   :  { %p171_p0 = por %p170_p13, %p169_p12 }
  0x1e   :  { %p172_p1 = pnand %p171_p0, %p165_p11 }
  0x20   :  { %175 = shalt.err (!%p172_p1)
}
  0x21   :  { %32 = dma.hbm_to_vmem [thread:$0]  %s228_s1, 256, %s27_s24, [#allocation6], %s181_s19, %s181_s19, %s182_s20  }
  0x22   :  { %176 = dma.done.wait [#allocation4], 256  }
  0x23   :  { %177 = vsyncadd [#allocation4], 4294967040 }
  0x24   :  { %178 = dma.done.wait [#allocation6], 256  }
  0x25   :  { %179 = vsyncadd [#allocation6], 4294967040  ;;  %v184_v0 = vmov 0.0   ;;  %v44_v1 = vld [vmem:[#allocation3] sm:$0xff]  ;;  %v45_v2 = vld [vmem:[#allocation3 + $0x8] sm:$0xff]  ;;  %vm97_vm2 = vcmask 1041409  }
  0x26   :  { %43 = vst [vmem:[#allocation2] sm:$0x3] %v184_v0  ;;  %v54_v3 = vand.u32 2147483647, %v44_v1  ;;  %v55_v4 = vand.u32 2147483647, %v45_v2 }
  0x27   :  { %v46_v15 = vld [vmem:[#allocation5] sm:$0xff]  ;;  %v47_v16 = vld [vmem:[#allocation5 + $0x8] sm:$0xff]  ;;  %v48_v18 = vmax.f32 %v44_v1, 0.0  ;;  %v49_v22 = vmax.f32 %v45_v2, 0.0  ;;  %vm106_vm3 = vcmask 1041408   ;;  %vm111_vm4 = vcmask 1024  }
  0x28   :  { %v56_v5 = vsub.f32 0.0, %v54_v3  ;;  %v57_v6 = vsub.f32 0.0, %v55_v4  ;;  %v50_v19 = vmul.f32 %v46_v15, %v44_v1  ;;  %v51_v23 = vmul.f32 %v47_v16, %v45_v2 }
  0x2a   :  { %v58_v7 = vmul.f32 1.442695, %v56_v5  ;;  %v60_v8 = vmul.f32 1.442695, %v57_v6  ;;  %v52_v27 = vsub.f32 %v48_v18, %v50_v19  ;;  %v53_v30 = vsub.f32 %v49_v22, %v51_v23 }
  0x2c   :  { %124 = vpow2.f32 %v58_v7 }
  0x2d   :  { %126 = vpow2.f32 %v60_v8  ;;  %v82_v48 = vld [vmem:[#allocation2] sm:$0x3] }
  0x36   :  { %v125_v9 = vpop.eup %124 }
  0x37   :  { %v127_v10 = vpop.eup %126  ;;  %v62_v11 = vadd.f32 1.0, %v125_v9  ;;  %v65_v13 = vmul.f32 -0.5, %v125_v9  ;;  %v68_v20 = vand.u32 2147483647, %v125_v9 }
  0x38   :  { %v71_v12 = vadd.f32 1.0, %v127_v10  ;;  %v74_v14 = vmul.f32 -0.5, %v127_v10  ;;  %v77_v24 = vand.u32 2147483647, %v127_v10 }
  0x39   :  { %128 = vlog2.f32 %v62_v11  ;;  %v66_v17 = vadd.f32 1.0, %v65_v13  ;;  %vm69_vm0 = vcmp.lt.f32.partialorder %v68_v20, 0.0004427343 }
  0x3a   :  { %130 = vlog2.f32 %v71_v12  ;;  %v75_v21 = vadd.f32 1.0, %v74_v14  ;;  %vm78_vm1 = vcmp.lt.f32.partialorder %v77_v24, 0.0004427343 }
  0x3b   :  { %v67_v25 = vmul.f32 %v125_v9, %v66_v17 }
  0x3c   :  { %v76_v28 = vmul.f32 %v127_v10, %v75_v21 }
  0x43   :  { %v129_v26 = vpop.eup %128 }
  0x44   :  { %v131_v29 = vpop.eup %130  ;;  %v64_v31 = vmul.f32 0.6931472, %v129_v26 }
  0x45   :  { %v73_v32 = vmul.f32 0.6931472, %v131_v29 }
  0x46   :  { %v70_v33 = vsel %vm69_vm0, %v67_v25, %v64_v31 }
  0x47   :  { %v79_v34 = vsel %vm78_vm1, %v76_v28, %v73_v32  ;;  %v80_v35 = vadd.f32 %v70_v33, %v52_v27 }
  0x48   :  { %v81_v36 = vadd.f32 %v79_v34, %v53_v30 }
  0x49   :  { %v83_v37 = vrot.slane %v80_v35, 4 }
  0x4a   :  { %v89_v38 = vrot.slane %v81_v36, 4 }
  0x4b   :  { %v84_v39 = vadd.f32 %v83_v37, %v80_v35 }
  0x4c   :  { %v90_v40 = vadd.f32 %v89_v38, %v81_v36 }
  0x4d   :  { %v85_v41 = vrot.slane %v84_v39, 2 }
  0x4e   :  { %v91_v42 = vrot.slane %v90_v40, 2 }
  0x4f   :  { %v86_v43 = vadd.f32 %v85_v41, %v84_v39 }
  0x50   :  { %v92_v44 = vadd.f32 %v91_v42, %v90_v40 }
  0x51   :  { %v87_v45 = vrot.slane %v86_v43, 1 }
  0x52   :  { %v93_v46 = vrot.slane %v92_v44, 1 }
  0x53   :  { %v88_v47 = vadd.f32 %v87_v45, %v86_v43 }
  0x54   :  { %v94_v49 = vadd.f32 %v93_v46, %v92_v44 }
  0x56   :  { %v98_v50 = vsel %vm97_vm2, %v94_v49, %v88_v47 }
  0x57   :  { %v100_v51 = vadd.f32 %v98_v50, %v82_v48 }
  0x59   :  { %101 = vst [vmem:[#allocation2] sm:$0x3] %v100_v51 }
  0x60   :  { %v105_v52 = vld [vmem:[#allocation2] sm:$0x3] }
  0x61   :  { %v107_v53 = vsel %vm106_vm3, %v105_v52, 0.0 }
  0x62   :  { %108 = vadd.xlane.f32.xlu0 %v107_v53 }
  0xef   :  { %v109_v54 = vpop.xlane.xlu0 %108 }
  0xf0   :  { %v110_v55 = vmul.f32 0.0009765625, %v109_v54 }
  0xf2   :  { %112 = vst.msk [vmem:[%s229_s2] sm:$0x3] %vm111_vm4, %v110_v55 }
  0xf3   :  { %117 = vsyncpa [#allocation4], 1 }
  0xf4   :  { %118 = vsyncpa [#allocation6], 1 }

</bundles_post_ra>
